<compile_context>
chip_gen: v7x
topology: tpu7x:2x2x1
jax: 0.10.0
libtpu: 0.0.40
codegen_flags: <defaults>
</compile_context>

<pallas_src>
import functools

import jax
import jax.numpy as jnp
from jax.experimental import pallas as pl
from jax.experimental.pallas import tpu as pltpu


# ----------------------------------------------------------------------------
# Pallas kernel: 1x1 conv as W[Cout,Cin] @ X[Cin, tile_hw] (+ bias).
# ----------------------------------------------------------------------------
def _conv1x1_kernel(x_ref, w_ref, b_ref, o_ref):
    # x_ref: (1, Cin, T)   w_ref: (Cout, Cin)   b_ref: (Cout, 1)   o_ref: (1, Cout, T)
    acc = jnp.dot(w_ref[...], x_ref[0], preferred_element_type=jnp.float32)
    # Bias add rides in the VPU slot (zeros when bias=False) -- effectively free.
    o_ref[0] = (acc + b_ref[...]).astype(o_ref.dtype)


def _pick_tile_hw(hw: int, max_tile: int) -> int:
    """Largest lane-dense tile: a multiple of 128 up to max_tile, or full HW."""
    if hw >= 128:
        return min((hw // 128) * 128, max_tile)
    return hw  # tiny spatial map: single full-extent block


@functools.partial(jax.jit, static_argnames=("max_tile",))
def conv1x1_pallas(x_nchw, weight, bias=None, *, max_tile=2048):
    """1x1 conv (stride 1, no padding) via Pallas.

    x_nchw : (N, Cin, H, W) float32
    weight : (Cout, Cin, 1, 1) float32   (PyTorch Conv2d layout)
    bias   : (Cout,) float32 or None
    returns: (N, Cout, H, W) float32
    """
    n, cin, h, w = x_nchw.shape
    cout = weight.shape[0]
    hw = h * w

    # Pure reshapes -- no transpose, no extra HBM pass.
    x3d = x_nchw.reshape(n, cin, hw)              # channels on sublanes, HW on lanes
    w2d = weight.reshape(cout, cin)
    if bias is None:
        b2d = jnp.zeros((cout, 1), x_nchw.dtype)
    else:
        b2d = bias.reshape(cout, 1)

    tile_hw = _pick_tile_hw(hw, max_tile)
    grid = (n, pl.cdiv(hw, tile_hw))              # >= 2 steps (batch axis) for megacore

    out3d = pl.pallas_call(
        _conv1x1_kernel,
        out_shape=jax.ShapeDtypeStruct((n, cout, hw), x_nchw.dtype),
        grid_spec=pltpu.PrefetchScalarGridSpec(
            num_scalar_prefetch=0,
            grid=grid,
            in_specs=[
                pl.BlockSpec((1, cin, tile_hw), lambda i, j: (i, 0, j)),
                pl.BlockSpec((cout, cin), lambda i, j: (0, 0)),
                pl.BlockSpec((cout, 1), lambda i, j: (0, 0)),
            ],
            out_specs=pl.BlockSpec((1, cout, tile_hw), lambda i, j: (i, 0, j)),
        ),
        compiler_params=pltpu.CompilerParams(
            dimension_semantics=("parallel", "parallel"),
        ),
    )(x3d, w2d, b2d)

    return out3d.reshape(n, cout, h, w)


# ----------------------------------------------------------------------------
# DBNeck (JAX/Pallas version).
# ----------------------------------------------------------------------------
class DBNeckPallas:
    def __init__(self, data_point, exp, layer_num, bias=False, *, key):
        assert layer_num == 0, (
            "HourGlass is undefined in the reference module; only layer_num=0 "
            "(identity Sequential) is reproducible."
        )
        self.exp = exp
        self.bias = bias
        self.weights = []
        self.biases = []
        for cin in data_point:
            key, wk, bk = jax.random.split(key, 3)
            # Deterministic synthetic init (Conv2d weight shape: (Cout, Cin, 1, 1)).
            self.weights.append(
                jax.random.normal(wk, (exp, cin, 1, 1), jnp.float32) * 0.05
            )
            if bias:
                self.biases.append(
                    jax.random.normal(bk, (exp,), jnp.float32) * 0.05
                )
            else:
                self.biases.append(None)

    def __call__(self, feature):
        # With layer_num=0 the hour-glass stack is the identity Sequential and
        # only self._ins[-1](feature[-1]) reaches the output; the other three
        # convs are dead code, so we skip their kernels entirely.
        # TODO(synk): when HourGlass exists, run conv1x1_pallas on every branch
        #             and feed all of them through the hour-glass stack.
        return conv1x1_pallas(feature[-1], self.weights[-1], self.biases[-1])


# ----------------------------------------------------------------------------
# Demo / self-check.
# ----------------------------------------------------------------------------
if __name__ == "__main__":
    key = jax.random.PRNGKey(0)

    # 4 features at scales 1/32, 1/16, 1/8, 1/4 of a notional 64x64 image.
    data_point = (32, 16, 8, 4)           # input channels per scale
    spatial = (2, 4, 8, 16)               # square spatial dims per scale
    exp = 32
    batch = 2

    feats = []
    for cin, s in zip(data_point, spatial):
        key, fk = jax.random.split(key)
        feats.append(jax.random.normal(fk, (batch, cin, s, s), jnp.float32))

    key, mk = jax.random.split(key)
    neck = DBNeckPallas(data_point, exp, layer_num=0, bias=False, key=mk)

    out = neck(feats)
    out = jax.block_until_ready(out)

    # Sanity-check against a pure-JAX reference for the returned branch.
    w_last = neck.weights[-1].reshape(exp, data_point[-1])
    ref = jnp.einsum("nchw,oc->nohw", feats[-1], w_last)
    assert out.shape == (batch, exp, spatial[-1], spatial[-1])
    assert jnp.allclose(out, ref, atol=1e-4, rtol=1e-4)

    # Also exercise the bias path once (covers the second kernel configuration).
    key, bk = jax.random.split(key)
    b_test = jax.random.normal(bk, (exp,), jnp.float32) * 0.05
    out_b = jax.block_until_ready(
        conv1x1_pallas(feats[-1], neck.weights[-1], b_test)
    )
    ref_b = ref + b_test.reshape(1, exp, 1, 1)
    assert jnp.allclose(out_b, ref_b, atol=1e-4, rtol=1e-4)

    print("KERNEL_OK")
</pallas_src>

<mosaic_0001>
module attributes {stable_mosaic.version = 11 : i64} {
  func.func @_conv1x1_kernel(%arg0: i32, %arg1: i32, %arg2: memref<1x4x256xf32, #tpu.memory_space<vmem>>, %arg3: memref<32x4xf32, #tpu.memory_space<vmem>>, %arg4: memref<32x1xf32, #tpu.memory_space<vmem>>, %arg5: memref<1x32x256xf32, #tpu.memory_space<vmem>>) attributes {dimension_semantics = [#tpu.dimension_semantics<parallel>, #tpu.dimension_semantics<parallel>], iteration_bounds = array<i64: 2, 1>, scalar_prefetch = 0 : i64, scratch_operands = 0 : i64, tpu.core_type = #tpu.core_type<tc>, window_params = [{transform_indices = @transform_0, window_bounds = array<i64: 1, 4, 256>}, {pipeline_mode = #tpu.pipeline_mode<synchronous>, transform_indices = @transform_1, window_bounds = array<i64: 32, 4>}, {pipeline_mode = #tpu.pipeline_mode<synchronous>, transform_indices = @transform_2, window_bounds = array<i64: 32, 1>}, {transform_indices = @transform_3, window_bounds = array<i64: 1, 32, 256>}]} {
    %c0 = arith.constant 0 : index
    %c0_0 = arith.constant 0 : index
    %0 = vector.load %arg3[%c0, %c0_0] : memref<32x4xf32, #tpu.memory_space<vmem>>, vector<32x4xf32>
    %c0_1 = arith.constant 0 : index
    %c0_2 = arith.constant 0 : index
    %c0_3 = arith.constant 0 : index
    %1 = vector.load %arg2[%c0_1, %c0_2, %c0_3] : memref<1x4x256xf32, #tpu.memory_space<vmem>>, vector<1x4x256xf32>
    %2 = vector.shape_cast %1 : vector<1x4x256xf32> to vector<4x256xf32>
    %cst = arith.constant dense<0.000000e+00> : vector<32x256xf32>
    %3 = tpu.matmul %0, %2, %cst {dimension_numbers = #tpu.dot_dimension_numbers<[1], [0], [0], [1], [0, 0, 1, 1], [], []>} : vector<32x4xf32>, vector<4x256xf32>, vector<32x256xf32> -> vector<32x256xf32>
    %c0_4 = arith.constant 0 : index
    %c0_5 = arith.constant 0 : index
    %4 = vector.load %arg4[%c0_4, %c0_5] : memref<32x1xf32, #tpu.memory_space<vmem>>, vector<32x1xf32>
    %5 = vector.broadcast %4 : vector<32x1xf32> to vector<32x256xf32>
    %6 = arith.addf %3, %5 : vector<32x256xf32>
    %c0_6 = arith.constant 0 : index
    %c0_7 = arith.constant 0 : index
    %c0_8 = arith.constant 0 : index
    %7 = vector.load %arg5[%c0_6, %c0_7, %c0_8] : memref<1x32x256xf32, #tpu.memory_space<vmem>>, vector<1x32x256xf32>
    %8 = vector.shape_cast %7 : vector<1x32x256xf32> to vector<32x256xf32>
    %9 = vector.shape_cast %6 : vector<32x256xf32> to vector<1x32x256xf32>
    tpu.vector_store %arg5[%c0_6, %c0_7, %c0_8], %9 {strides = array<i32>} : memref<1x32x256xf32, #tpu.memory_space<vmem>>, vector<1x32x256xf32>,
    return
  }
  func.func @transform_0(%arg0: i32, %arg1: i32) -> (i32, i32, i32) {
    %c0_i32 = arith.constant 0 : i32
    %c0_i32_0 = arith.constant 0 : i32
    return %arg0, %c0_i32, %arg1 : i32, i32, i32
  }
  func.func @transform_1(%arg0: i32, %arg1: i32) -> (i32, i32) {
    %c0_i32 = arith.constant 0 : i32
    %c0_i32_0 = arith.constant 0 : i32
    %c0_i32_1 = arith.constant 0 : i32
    return %c0_i32, %c0_i32_0 : i32, i32
  }
  func.func @transform_2(%arg0: i32, %arg1: i32) -> (i32, i32) {
    %c0_i32 = arith.constant 0 : i32
    %c0_i32_0 = arith.constant 0 : i32
    %c0_i32_1 = arith.constant 0 : i32
    return %c0_i32, %c0_i32_0 : i32, i32
  }
  func.func @transform_3(%arg0: i32, %arg1: i32) -> (i32, i32, i32) {
    %c0_i32 = arith.constant 0 : i32
    %c0_i32_0 = arith.constant 0 : i32
    return %arg0, %c0_i32, %arg1 : i32, i32, i32
  }
}

</mosaic_0001>

<bundles_post_ra>
// kernel: conv1x1_pallas.1
= control target key start
LH: loop header
LB: loop body
LE: loop exit
PB: predicated region body
PF: predicated region fallthrough
CT: control target
= control target key end

     0   :  { %s539_s12 = smov 0   ;;  %s541_s13 = smov 0   ;;  %s600_s0 = inlined_call_operand.vmem [shape: f32[2,4,256], index: 0, kind: input, shape index: {}]   ;;  %s601_s1 = inlined_call_operand.vmem [shape: f32[32,4], index: 1, kind: input, shape index: {}]   ;;  %s602_s2 = inlined_call_operand.vmem [shape: f32[32,1], index: 2, kind: input, shape index: {}]   ;;  %s603_s3 = inlined_call_operand.vmem [shape: f32[2,32,256], index: 3, kind: output, shape index: {}]  }
   0x1   :  { %s543_s14 = smov 0  }
   0x2 LB: > { %s25_s15 = sadd.s32 1, %s511_s13  ;;  %p447_p0 = scmp.ge.s32.totalorder %s515_s14, 1  ;;  %s515_s14 = sphi %s543_s14, %s13_s14   ;;  %s511_s13 = sphi %s541_s13, %s605_s13   ;;  %s507_s12 = sphi %s539_s12, %s604_s12  }
   0x3   : > { %p27_p1 = scmp.ge.s32.totalorder %s25_s15, 2  ;;  %p158_p2 = scmp.lt.s32.totalorder %s515_s14, 3 }
   0x5   : > { %s607_s15 = smov (%p27_p1, %s25_s15), 0  ;;  %p159_p3 = pnand %p447_p0, %p158_p2 }
   0x6   : > { %p191_p4 = scmp.lt.s32.totalorder (!%p159_p3), %s507_s12, 1  ;;  %v517_v0 = vmov (!%p159_p3), 0.0   ;;  %v217_v1 = vld [vmem:[%s602_s2 + $0x10] sm:$0xff] (!%p159_p3)  ;;  %v518_v2 = vmov (!%p159_p3), 0   ;;  %v215_v3 = vld [vmem:[%s602_s2] sm:$0xff] (!%p159_p3)  ;;  %v218_v4 = vld [vmem:[%s602_s2 + $0x18] sm:$0xff] (!%p159_p3) }
   0x7   : > { %162 = sbr.rel (%p159_p3) target bundleno = 242 (0xf2), region = 32  ;;  %323 = vmatprep.mubr.f32.mxu0 (!%p159_p3), %v517_v0  ;;  %335 = vmatprep.mubr.f32.mxu1 (!%p159_p3), %v517_v0  ;;  %v216_v5 = vld [vmem:[%s602_s2 + $0x8] sm:$0xff] (!%p159_p3)  ;;  %vm254_vm0 = vcmask (!%p159_p3), 1043456   ;;  %v210_v8 = vld [vmem:[%s601_s1] sm:$0xff] (!%p159_p3)  ;;  %vm241_vm1 = vcmask (!%p159_p3), 31744   ;;  %v212_v9 = vld [vmem:[%s601_s1 + $0x10] sm:$0xff] (!%p159_p3) }
   0x8   : > { %491 = vset.pattern.permute.xlu1 (!%p159_p3), %v518_v2  ;;  %490 = vset.pattern.permute.xlu0 (!%p159_p3), %v518_v2  ;;  %v211_v10 = vld [vmem:[%s601_s1 + $0x8] sm:$0xff] (!%p159_p3)  ;;  %v213_v11 = vld [vmem:[%s601_s1 + $0x18] sm:$0xff] (!%p159_p3) }
   0x9   : > { %231 = vperm.xlu1 (!%p159_p3), %491, %v217_v1   ;;  %221 = vperm.xlu0 (!%p159_p3), %490, %v215_v3  }
   0xd   : > { %236 = vperm.xlu1 (!%p159_p3), %491, %v218_v4   ;;  %226 = vperm.xlu0 (!%p159_p3), %490, %v216_v5  }
   0xe   : > { %s609_s12 = smov (!%p191_p4, %s507_s12), 1 }
   0xf   : > { %s460_s20 = sshll.u32 %s609_s12, 3  ;;  %s461_s9 = sshll.u32 %s609_s12, 6 }
  0x10   : > { %s198_s27 = scalar_lea.vmem %s600_s0, %s460_s20  ;;  %s208_s16 = scalar_lea.vmem %s603_s3, %s461_s9 }
  0x11   : > { %v214_v6 = vld [vmem:[%s198_s27] sm:$0xff] }
  0x12   : > { %v240_v7 = vcombine.high %v214_v6, %v214_v6 }
  0x14   : > { %452 = vmatprep.subr.msk.mxu0 %vm254_vm0, %v240_v7  ;;  %462 = vmatprep.subr.msk.mxu1 %vm254_vm0, %v240_v7 }
  0x15   : > { %453 = vmatpush1.msk.msra.mxu0 %vm254_vm0, %v214_v6  ;;  %463 = vmatpush1.msk.msra.mxu1 %vm254_vm0, %v214_v6 }
  0x16   : > { %454 = vmatmul.mubr.msk.f32.vlgmr.msra.gmra.mrb[0].mxu0 %vm241_vm1, %v210_v8  ;;  %456 = vmatmul.mubr.msk.f32.vlgmr.msra.gmra.mrb[0].mxu1 %vm241_vm1, %v212_v9 }
  0x17   : > { %329 = vmatprep.mubr.f32.mxu0 %v517_v0  ;;  %341 = vmatprep.mubr.f32.mxu1 %v517_v0 }
  0x1a   : > { %455 = vmatmul.mubr.msk.f32.gmra.mrb[2].mxu0 %vm241_vm1, %v211_v10  ;;  %457 = vmatmul.mubr.msk.f32.gmra.mrb[2].mxu1 %vm241_vm1, %v213_v11 }
  0x88   : > { %v232_v12 = vpop.permute.xlu1 %231  ;;  %v222_v13 = vpop.permute.xlu0 %221 }
  0x8c   : > { %v237_v22 = vpop.permute.xlu1 %236  ;;  %v227_v23 = vpop.permute.xlu0 %226 }
  0xe9   : > { %v325_v14 = vpop.f32.mrb[0].mxu0  ;;  %v337_v15 = vpop.f32.mrb[0].mxu1 }
  0xea   : > { %v326_v16 = vadd.f32 %v325_v14, %v222_v13  ;;  %v338_v17 = vadd.f32 %v337_v15, %v232_v12  ;;  %v327_v18 = vpop.f32.mrb[1].mxu0  ;;  %v339_v19 = vpop.f32.mrb[1].mxu1 }
  0xeb   : > { %v328_v20 = vadd.f32 %v327_v18, %v222_v13  ;;  %v340_v21 = vadd.f32 %v339_v19, %v232_v12 }
  0xec   : > { %348 = vst [vmem:[%s208_s16] sm:$0xff] %v326_v16  ;;  %352 = vst [vmem:[%s208_s16 + $0x20] sm:$0xff] %v338_v17 }
  0xed   : > { %349 = vst [vmem:[%s208_s16 + $0x8] sm:$0xff] %v328_v20  ;;  %353 = vst [vmem:[%s208_s16 + $0x28] sm:$0xff] %v340_v21  ;;  %v331_v24 = vpop.f32.mrb[2].mxu0  ;;  %v343_v25 = vpop.f32.mrb[2].mxu1 }
  0xee   : > { %v332_v26 = vadd.f32 %v331_v24, %v227_v23  ;;  %v344_v27 = vadd.f32 %v343_v25, %v237_v22  ;;  %v333_v28 = vpop.f32.mrb[3].mxu0  ;;  %v345_v29 = vpop.f32.mrb[3].mxu1 }
  0xef   : > { %v334_v30 = vadd.f32 %v333_v28, %v227_v23  ;;  %v346_v31 = vadd.f32 %v345_v29, %v237_v22 }
  0xf0   : > { %350 = vst [vmem:[%s208_s16 + $0x10] sm:$0xff] %v332_v26  ;;  %354 = vst [vmem:[%s208_s16 + $0x30] sm:$0xff] %v344_v27 }
  0xf1   : > { %351 = vst [vmem:[%s208_s16 + $0x18] sm:$0xff] %v334_v30  ;;  %355 = vst [vmem:[%s208_s16 + $0x38] sm:$0xff] %v346_v31 }
  0xf2 PF: > { %s13_s14 = sadd.s32 1, %s515_s14   ;;  %s604_s12 = smov %s511_s13 }
  0xf3   : > { %p10_p5 = scmp.ge.s32.totalorder %s13_s14, 4   ;;  %s605_s13 = smov %s607_s15 }
  0xf5   :  { %12 = sbr.rel (!%p10_p5) target bundleno = 2 (0x2), region = 62 }

</bundles_post_ra>
